<compile_context>
chip_gen: v7x
topology: tpu7x:2x2x1
jax: 0.10.0
libtpu: 0.0.40
codegen_flags: <defaults>
</compile_context>

<pallas_src>
import functools

import jax
import jax.numpy as jnp
from jax import lax
from jax.experimental import pallas as pl
from jax.experimental.pallas import tpu as pltpu

_LANES = 128


def _double_margin_kernel(nm_ref, pos_ref, neg_ref, out_ref, *,
                          tile_rows, blocks_per_split, total_blocks,
                          rows_in_last_block, has_oob_blocks):
    c = pl.program_id(0)                 # megacore split axis ("parallel")
    j = pl.program_id(1)                 # streaming axis ("arbitrary")

    @pl.when(j == 0)
    def _():
        out_ref[...] = jnp.zeros_like(out_ref)

    neg_margin = nm_ref[0]               # 1.0 + margin (hoisted to wrapper)
    logical_block = c * blocks_per_split + j

    def fold(x):
        # (tile_rows,128) -> (8,128): regroups sublanes in native (8,128)
        # tiles, so the reshape is layout-preserving and the sum is pure VPU
        # adds with a single-vreg destination.
        return jnp.sum(x.reshape(tile_rows // 8, 8, _LANES), axis=0)

    def make_contrib():
        pos = pos_ref[...].astype(jnp.float32)
        neg = neg_ref[...].astype(jnp.float32)
        return (jnp.maximum(neg_margin - neg, jnp.float32(0.0))
                + jnp.maximum(pos - jnp.float32(1.0), jnp.float32(0.0)))

    def accumulate_full():
        out_ref[...] += fold(make_contrib())

    def accumulate_last():
        # Only the last logical block may extend past the array: mask its
        # invalid rows (runs for exactly one grid step).
        row = lax.broadcasted_iota(jnp.int32, (tile_rows, _LANES), 0)
        out_ref[...] += fold(jnp.where(row < rows_in_last_block,
                                       make_contrib(), jnp.float32(0.0)))

    if rows_in_last_block == tile_rows:          # static: blocks divide rows
        def accumulate():
            accumulate_full()
    else:
        def accumulate():
            pl.when(logical_block != total_blocks - 1)(accumulate_full)
            pl.when(logical_block == total_blocks - 1)(accumulate_last)

    if has_oob_blocks:
        # Clamped re-read of the last block: skip its (already counted) data.
        pl.when(logical_block < total_blocks)(accumulate)
    else:
        accumulate()


def _detect_num_tensorcores():
    """Best-effort TensorCore count per device (1 on v5e/v6e, 2 on v7x)."""
    try:
        info = pltpu.get_tpu_info()
        for attr in ("num_cores", "core_count", "num_tensor_cores",
                     "tensorcores_per_chip"):
            v = getattr(info, attr, None)
            if isinstance(v, int) and v > 0:
                return min(int(v), 2)
    except Exception:
        pass
    return 1


def double_margin_loss(pos, neg, margin, *, tile_rows=4096, num_splits=None):
    """Pallas implementation of double_marginLoss.forward(pos, neg, margin)."""
    pos_f = pos.reshape(-1)
    neg_f = neg.reshape(-1)
    n = pos_f.shape[0]
    if neg_f.shape[0] != n:
        raise ValueError("pos and neg must have the same number of elements")

    neg_margin_f = jnp.float32(1.0) + jnp.asarray(margin, dtype=jnp.float32)

    if n == 0:
        return jnp.float32(0.0)

    rows = n // _LANES
    lane_tail = n - rows * _LANES

    if rows < 8:
        # Tiny input (< 1024 elements): not worth a kernel launch.
        p32 = pos_f.astype(jnp.float32)
        n32 = neg_f.astype(jnp.float32)
        return (jnp.sum(jnp.maximum(neg_margin_f - n32, 0.0))
                + jnp.sum(jnp.maximum(p32 - 1.0, 0.0)))

    # <128-element lane tail folded with plain jnp -- no full-array pad.
    tail_loss = jnp.float32(0.0)
    if lane_tail:
        pos_t = pos_f[rows * _LANES:].astype(jnp.float32)
        neg_t = neg_f[rows * _LANES:].astype(jnp.float32)
        tail_loss = (jnp.sum(jnp.maximum(neg_margin_f - neg_t, 0.0))
                     + jnp.sum(jnp.maximum(pos_t - 1.0, 0.0)))
        # TODO(synk): for non-128-aligned n the prefix slice below may still
        # materialize one copy; the aligned path is copy-free.
        pos2 = pos_f[: rows * _LANES].reshape(rows, _LANES)
        neg2 = neg_f[: rows * _LANES].reshape(rows, _LANES)
    else:
        pos2 = pos_f.reshape(rows, _LANES)
        neg2 = neg_f.reshape(rows, _LANES)

    # Tile rows: multiple of 8 (for the (8,128) fold), never exceeding rows.
    # TODO(synk): on v6e tile_rows=8192 + vmem_limit_bytes gives a further
    # per-step-overhead win; 4096 is the safe-everywhere default.
    tile_rows_eff = min(tile_rows, rows - rows % 8)
    tile_rows_eff -= tile_rows_eff % 8

    total_blocks = pl.cdiv(rows, tile_rows_eff)
    rows_in_last_block = rows - (total_blocks - 1) * tile_rows_eff

    if num_splits is None:
        num_splits = _detect_num_tensorcores()
    num_splits = max(1, min(int(num_splits), total_blocks))
    blocks_per_split = pl.cdiv(total_blocks, num_splits)
    has_oob_blocks = num_splits * blocks_per_split > total_blocks

    if has_oob_blocks:
        def data_map(c, j):
            return (jnp.minimum(c * blocks_per_split + j, total_blocks - 1), 0)
    else:
        def data_map(c, j):
            return (c * blocks_per_split + j, 0)

    kernel = functools.partial(
        _double_margin_kernel,
        tile_rows=tile_rows_eff,
        blocks_per_split=blocks_per_split,
        total_blocks=total_blocks,
        rows_in_last_block=rows_in_last_block,
        has_oob_blocks=has_oob_blocks,
    )

    n_main = rows * _LANES
    cost = pl.CostEstimate(
        flops=5 * n_main,
        transcendentals=0,
        bytes_accessed=n_main * (pos2.dtype.itemsize + neg2.dtype.itemsize)
        + num_splits * 8 * _LANES * 4,
    )

    # TODO(synk): on v7x, switch axis 0 to pltpu.CORE_PARALLEL (or pl.core_map)
    # after verifying plain "parallel" actually shards across both TensorCores.
    partials = pl.pallas_call(
        kernel,
        out_shape=jax.ShapeDtypeStruct((num_splits * 8, _LANES), jnp.float32),
        grid=(num_splits, blocks_per_split),
        in_specs=[
            pl.BlockSpec(memory_space=pltpu.MemorySpace.SMEM),      # neg_margin
            pl.BlockSpec((tile_rows_eff, _LANES), data_map),        # pos tiles
            pl.BlockSpec((tile_rows_eff, _LANES), data_map),        # neg tiles
        ],
        out_specs=pl.BlockSpec((8, _LANES), lambda c, j: (c, 0)),   # per-split partial
        compiler_params=pltpu.CompilerParams(
            dimension_semantics=("parallel", "arbitrary"),
        ),
        cost_estimate=cost,
    )(neg_margin_f.reshape(1), pos2, neg2)

    return jnp.sum(partials) + tail_loss


def _reference(pos, neg, margin):
    pos = pos.astype(jnp.float32)
    neg = neg.astype(jnp.float32)
    pos_margin = 1.0
    neg_margin = pos_margin + margin
    return (jnp.sum(jnp.maximum(neg_margin - neg, 0.0))
            + jnp.sum(jnp.maximum(pos - pos_margin, 0.0)))


if __name__ == "__main__":
    key = jax.random.PRNGKey(0)
    k_pos, k_neg, k_pos2, k_neg2 = jax.random.split(key, 4)

    # Primary small example (score tensors of identical shape, scalar margin):
    # 2048 elements -> 16 lane-rows, single full block through the kernel.
    pos = jax.random.normal(k_pos, (32, 64), dtype=jnp.float32) + 1.0
    neg = jax.random.normal(k_neg, (32, 64), dtype=jnp.float32)
    margin = 1.0

    loss = jax.block_until_ready(double_margin_loss(pos, neg, margin))
    ref = _reference(pos, neg, margin)
    assert jnp.allclose(loss, ref, rtol=1e-5, atol=1e-5), (loss, ref)

    # Secondary check: non-lane-aligned size exercising the jnp lane-tail,
    # the masked partial last block, and the (possibly 2-way) split path.
    pos_b = jax.random.normal(k_pos2, (700, 410), dtype=jnp.float32) + 1.0
    neg_b = jax.random.normal(k_neg2, (700, 410), dtype=jnp.float32)
    loss_b = jax.block_until_ready(double_margin_loss(pos_b, neg_b, 0.5))
    ref_b = _reference(pos_b, neg_b, 0.5)
    assert jnp.allclose(loss_b, ref_b, rtol=1e-4, atol=1e-3), (loss_b, ref_b)

    print("KERNEL_OK")
</pallas_src>

<mosaic_0001>
module attributes {stable_mosaic.version = 11 : i64} {
  func.func @_double_margin_kernel(%arg0: i32, %arg1: i32, %arg2: memref<1xf32, #tpu.memory_space<smem>>, %arg3: memref<16x128xf32, #tpu.memory_space<vmem>>, %arg4: memref<16x128xf32, #tpu.memory_space<vmem>>, %arg5: memref<8x128xf32, #tpu.memory_space<vmem>>) attributes {dimension_semantics = [#tpu.dimension_semantics<parallel>, #tpu.dimension_semantics<arbitrary>], iteration_bounds = array<i64: 1, 1>, scalar_prefetch = 0 : i64, scratch_operands = 0 : i64, tpu.core_type = #tpu.core_type<tc>, window_params = [{transform_indices = @transform_0, window_bounds = array<i64: 1>}, {transform_indices = @transform_1, window_bounds = array<i64: 16, 128>}, {transform_indices = @transform_2, window_bounds = array<i64: 16, 128>}, {transform_indices = @transform_3, window_bounds = array<i64: 8, 128>}]} {
    %c0_i32 = arith.constant 0 : i32
    %0 = arith.cmpi eq, %arg1, %c0_i32 : i32
    %1 = arith.extui %0 : i1 to i32
    %c0_i32_0 = arith.constant 0 : i32
    %2 = arith.cmpi ne, %1, %c0_i32_0 : i32
    scf.if %2 {
      %cst_12 = arith.constant 0.000000e+00 : f32
      %20 = vector.broadcast %cst_12 : f32 to vector<8x128xf32>
      %c0_13 = arith.constant 0 : index
      %c0_14 = arith.constant 0 : index
      %21 = vector.load %arg5[%c0_13, %c0_14] : memref<8x128xf32, #tpu.memory_space<vmem>>, vector<8x128xf32>
      tpu.vector_store %arg5[%c0_13, %c0_14], %20 {strides = array<i32>} : memref<8x128xf32, #tpu.memory_space<vmem>>, vector<8x128xf32>,
    } else {
    }
    %c0 = arith.constant 0 : index
    %3 = memref.load %arg2[%c0] : memref<1xf32, #tpu.memory_space<smem>>
    %c0_1 = arith.constant 0 : index
    %c0_2 = arith.constant 0 : index
    %4 = vector.load %arg5[%c0_1, %c0_2] : memref<8x128xf32, #tpu.memory_space<vmem>>, vector<8x128xf32>
    %c0_3 = arith.constant 0 : index
    %c0_4 = arith.constant 0 : index
    %5 = vector.load %arg3[%c0_3, %c0_4] : memref<16x128xf32, #tpu.memory_space<vmem>>, vector<16x128xf32>
    %c0_5 = arith.constant 0 : index
    %c0_6 = arith.constant 0 : index
    %6 = vector.load %arg4[%c0_5, %c0_6] : memref<16x128xf32, #tpu.memory_space<vmem>>, vector<16x128xf32>
    %7 = vector.broadcast %3 : f32 to vector<16x128xf32>
    %8 = arith.subf %7, %6 : vector<16x128xf32>
    %cst = arith.constant 0.000000e+00 : f32
    %9 = vector.broadcast %cst : f32 to vector<16x128xf32>
    %10 = arith.maximumf %8, %9 : vector<16x128xf32>
    %cst_7 = arith.constant 1.000000e+00 : f32
    %11 = vector.broadcast %cst_7 : f32 to vector<16x128xf32>
    %12 = arith.subf %5, %11 : vector<16x128xf32>
    %cst_8 = arith.constant 0.000000e+00 : f32
    %13 = vector.broadcast %cst_8 : f32 to vector<16x128xf32>
    %14 = arith.maximumf %12, %13 : vector<16x128xf32>
    %15 = arith.addf %10, %14 : vector<16x128xf32>
    %16 = vector.shape_cast %15 : vector<16x128xf32> to vector<2x8x128xf32>
    %cst_9 = arith.constant dense<0.000000e+00> : vector<8x128xf32>
    %17 = vector.multi_reduction <add>, %16, %cst_9 [0] : vector<2x8x128xf32> to vector<8x128xf32>
    %18 = arith.addf %4, %17 : vector<8x128xf32>
    %c0_10 = arith.constant 0 : index
    %c0_11 = arith.constant 0 : index
    %19 = vector.load %arg5[%c0_10, %c0_11] : memref<8x128xf32, #tpu.memory_space<vmem>>, vector<8x128xf32>
    tpu.vector_store %arg5[%c0_10, %c0_11], %18 {strides = array<i32>} : memref<8x128xf32, #tpu.memory_space<vmem>>, vector<8x128xf32>,
    return
  }
  func.func @transform_0(%arg0: i32, %arg1: i32) -> i32 {
    %c0_i32 = arith.constant 0 : i32
    %c0_i32_0 = arith.constant 0 : i32
    return %c0_i32 : i32
  }
  func.func @transform_1(%arg0: i32, %arg1: i32) -> (i32, i32) {
    %c1_i32 = arith.constant 1 : i32
    %0 = arith.muli %arg0, %c1_i32 : i32
    %1 = arith.addi %0, %arg1 : i32
    %c0_i32 = arith.constant 0 : i32
    %c0_i32_0 = arith.constant 0 : i32
    return %1, %c0_i32 : i32, i32
  }
  func.func @transform_2(%arg0: i32, %arg1: i32) -> (i32, i32) {
    %c1_i32 = arith.constant 1 : i32
    %0 = arith.muli %arg0, %c1_i32 : i32
    %1 = arith.addi %0, %arg1 : i32
    %c0_i32 = arith.constant 0 : i32
    %c0_i32_0 = arith.constant 0 : i32
    return %1, %c0_i32 : i32, i32
  }
  func.func @transform_3(%arg0: i32, %arg1: i32) -> (i32, i32) {
    %c0_i32 = arith.constant 0 : i32
    %c0_i32_0 = arith.constant 0 : i32
    return %arg0, %c0_i32 : i32, i32
  }
}

</mosaic_0001>

<bundles_post_ra>
// kernel: tpu_custom_call.1
= control target key start
LH: loop header
LB: loop body
LE: loop exit
PB: predicated region body
PF: predicated region fallthrough
CT: control target
= control target key end

     0   :  { %9 = vsyncpa [#allocation4], 0  ;;  %s241_s0 = inlined_call_operand.<no memory space> [shape: f32[1], index: 0, kind: input, shape index: {}]   ;;  %s242_s1 = inlined_call_operand.hbm [shape: f32[16,128], index: 1, kind: input, shape index: {}]   ;;  %s243_s2 = inlined_call_operand.hbm [shape: f32[16,128], index: 2, kind: input, shape index: {}]   ;;  %s244_s3 = inlined_call_operand.hbm [shape: f32[8,128], index: 3, kind: output, shape index: {}]  }
   0x1   :  { %10 = vsyncpa [#allocation7], 0 }
   0x2   :  { %11 = vsyncpa [#allocation5], 0  ;;  %s177_s12 = smov [#allocation3]   ;;  %s105_s16 = scalar_lea.hbm %s242_s1, 256 }
   0x3   :  { %s23_s13 = sshll.u32 %s177_s12, 4  ;;  %p106_p0 = scmp.ne.s32.totalorder %s242_s1, %s105_s16  ;;  %s24_s13 = int_to_ptr.vmem [resolvable:$true] %s23_s13 }
   0x4   :  { %p109_p1 = scmp.lt.u32.totalorder %s105_s16, %s242_s1 }
   0x6   :  { %p111_p2 = pnand %p109_p1, %p106_p0 }
   0x8   :  { %114 = shalt.err (!%p111_p2)
}
   0x9   :  { %s115_s21 = scalar_lea.vmem %s24_s13, 256  ;;  %p120_p4 = scmp.lt.s32.totalorder %s24_s13, %s24_s13 }
   0xa   :  { %p116_p3 = scmp.ne.s32.totalorder %s24_s13, %s115_s21  ;;  %p121_p5 = scmp.lt.s32.totalorder %s115_s21, %s115_s21 }
   0xc   :  { %p122_p6 = por %p121_p5, %p120_p4 }
   0xe   :  { %p123_p7 = pnand %p122_p6, %p116_p3 }
  0x10   :  { %126 = shalt.err (!%p123_p7)
}
  0x11   :  { %s178_s22 = smov 128   ;;  %s179_s23 = smov 8  }
  0x12   :  { %29 = dma.hbm_to_vmem [thread:$0]  %s242_s1, 256, %s24_s13, [#allocation4], %s178_s22, %s178_s22, %s179_s23  }
  0x13   :  { %s180_s26 = smov [#allocation6]   ;;  %s127_s30 = scalar_lea.hbm %s243_s2, 256 }
  0x14   :  { %s39_s27 = sshll.u32 %s180_s26, 4  ;;  %p128_p8 = scmp.ne.s32.totalorder %s243_s2, %s127_s30  ;;  %s40_s27 = int_to_ptr.vmem [resolvable:$true] %s39_s27 }
  0x15   :  { %p131_p9 = scmp.lt.u32.totalorder %s127_s30, %s243_s2 }
  0x17   :  { %p133_p10 = pnand %p131_p9, %p128_p8 }
  0x19   :  { %136 = shalt.err (!%p133_p10)
}
  0x1a   :  { %s137_s8 = scalar_lea.vmem %s40_s27, 256  ;;  %p142_p12 = scmp.lt.s32.totalorder %s40_s27, %s40_s27 }
  0x1b   :  { %p138_p11 = scmp.ne.s32.totalorder %s40_s27, %s137_s8  ;;  %p143_p13 = scmp.lt.s32.totalorder %s137_s8, %s137_s8 }
  0x1d   :  { %p144_p0 = por %p143_p13, %p142_p12 }
  0x1f   :  { %p145_p1 = pnand %p144_p0, %p138_p11 }
  0x21   :  { %148 = shalt.err (!%p145_p1)
}
  0x22   :  { %45 = dma.hbm_to_vmem [thread:$0]  %s243_s2, 256, %s40_s27, [#allocation7], %s178_s22, %s178_s22, %s179_s23  }
  0x23   :  { %171 = dma.done.wait [#allocation4], 256  }
  0x24   :  { %172 = vsyncadd [#allocation4], 4294967040 }
  0x25   :  { %173 = dma.done.wait [#allocation7], 256  }
  0x26   :  { %174 = vsyncadd [#allocation7], 4294967040  ;;  %v67_v0 = vstv %s241_s0  ;;  %v63_v1 = vld [vmem:[#allocation3] sm:$0xff]  ;;  %v64_v2 = vld [vmem:[#allocation3 + $0x8] sm:$0xff]  ;;  %s181_s2 = smov [#allocation8]  }
  0x27   :  { %v65_v3 = vld [vmem:[#allocation6] sm:$0xff]  ;;  %v66_v4 = vld [vmem:[#allocation6 + $0x8] sm:$0xff]  ;;  %v97_v6 = vadd.f32 -1.0, %v63_v1  ;;  %v98_v7 = vadd.f32 -1.0, %v64_v2  ;;  %s87_s12 = sshll.u32 %s181_s2, 4  ;;  %s88_s12 = int_to_ptr.vmem [resolvable:$true] %s87_s12 }
  0x28   :  { %v68_v5 = vsub.f32 %v67_v0, %v65_v3  ;;  %v69_v8 = vsub.f32 %v67_v0, %v66_v4  ;;  %s149_s0 = scalar_lea.vmem %s88_s12, 128  ;;  %p154_p3 = scmp.lt.s32.totalorder %s88_s12, %s88_s12 }
  0x29   :  { %v74_v10 = vmax.f32 %v97_v6, 0.0  ;;  %v75_v11 = vmax.f32 %v98_v7, 0.0  ;;  %p150_p2 = scmp.ne.s32.totalorder %s88_s12, %s149_s0  ;;  %p155_p4 = scmp.lt.s32.totalorder %s149_s0, %s149_s0 }
  0x2a   :  { %v70_v9 = vmax.f32 %v68_v5, 0.0  ;;  %v71_v12 = vmax.f32 %v69_v8, 0.0 }
  0x2b   :  { %p156_p5 = por %p155_p4, %p154_p3 }
  0x2c   :  { %v76_v13 = vadd.f32 %v74_v10, %v70_v9  ;;  %v77_v14 = vadd.f32 %v75_v11, %v71_v12 }
  0x2d   :  { %p157_p6 = pnand %p156_p5, %p150_p2 }
  0x2e   :  { %v78_v15 = vadd.f32 %v77_v14, %v76_v13 }
  0x30   :  { %80 = vst [vmem:[#allocation8] sm:$0xff] %v78_v15 }
  0x31   :  { %160 = shalt.err (!%p157_p6)
}
  0x32   :  { %s161_s15 = scalar_lea.hbm %s244_s3, 128 }
  0x33   :  { %p162_p7 = scmp.ne.s32.totalorder %s244_s3, %s161_s15  ;;  %p165_p8 = scmp.lt.u32.totalorder %s161_s15, %s244_s3 }
  0x35   :  { %p167_p9 = pnand %p165_p8, %p162_p7 }
  0x37   :  { %170 = shalt.err (!%p167_p9)
}
  0x38   :  { %90 = dma.vmem_to_hbm [thread:$0]  %s88_s12, 128, %s244_s3, [#allocation5]  }
  0x39   :  { %175 = dma.done.wait [#allocation5], 128  }
  0x3a   :  { %176 = vsyncadd [#allocation5], 4294967168 }
  0x3b   :  { %94 = vsyncpa [#allocation4], 1 }
  0x3c   :  { %95 = vsyncpa [#allocation7], 1 }
  0x3d   :  { %96 = vsyncpa [#allocation5], 1 }

</bundles_post_ra>
